<compile_context>
chip_gen: v5e
topology: v5e:2x2
jax: 0.10.0
libtpu: 0.0.40
codegen_flags: <defaults>
</compile_context>

<pallas_src>
import functools

import jax
import jax.numpy as jnp
from jax.experimental import pallas as pl
from jax.experimental.pallas import tpu as pltpu


def _round_up(x, m):
    return ((x + m - 1) // m) * m


def _choose_batch_tile(batch, max_tile):
    """Batch tile minimizing padding waste (ties -> larger tile); then, if waste-free,
    shrink so the parallel batch axis has >= 2 grid steps (v7x has 2 TensorCores)."""
    if batch < 8:
        return batch, batch  # full-dim sublane block is allowed
    cands = [t for t in (512, 256, 128, 64, 32, 16, 8) if t <= max_tile] or [8]
    best_tile, best_waste = None, None
    for t in cands:  # descending order => ties keep the larger tile
        waste = _round_up(batch, t) - batch
        if best_waste is None or waste < best_waste:
            best_tile, best_waste = t, waste
    while (_round_up(batch, best_tile) // best_tile) < 2 and best_tile > 8:
        half = best_tile // 2
        if _round_up(batch, half) - batch <= best_waste:
            best_tile, best_waste = half, _round_up(batch, half) - batch
        else:
            break
    return best_tile, _round_up(batch, best_tile)


def _choose_k_block(input_dim):
    """K block: single full-dim block for small / non-128-multiple input_dim; otherwise tile K
    (largest 128-multiple divisor <= 4096) so VMEM stays bounded on v7x (64 MiB/TC)."""
    if input_dim % 128 != 0 or input_dim <= 4096:
        return input_dim
    for kb in (4096, 2048, 1024, 512, 256, 128):
        if input_dim % kb == 0:
            return kb
    return input_dim


def classblock_kernel(x_ref, w1_ref, b1_ref, w2_ref, b2_ref, out_ref, acc_ref):
    k = pl.program_id(1)

    @pl.when(k == 0)
    def _():
        acc_ref[...] = jnp.zeros_like(acc_ref)

    # Bottleneck linear with BN pre-folded into w1/b1. x is cast to bf16 in-kernel
    # (cheap VPU work) so the wrapper never materializes a converted copy in HBM.
    acc_ref[...] += jnp.dot(x_ref[...].astype(jnp.bfloat16), w1_ref[...],
                            preferred_element_type=jnp.float32)

    @pl.when(k == pl.num_programs(1) - 1)
    def _():
        h = acc_ref[...] + b1_ref[...]
        # Classifier linear (bf16 MXU, f32 accumulate).
        logits = jnp.dot(h.astype(w2_ref.dtype), w2_ref[...],
                         preferred_element_type=jnp.float32)
        out_ref[...] = (logits + b2_ref[...]).astype(out_ref.dtype)


def prepare_classblock_params(params, eps=1e-5, class_pad_bias=-1e30):
    """One-time parameter prep (outside the forward hot path): fold BN into the bottleneck
    linear, transpose to (in, out), pad bottleneck/class dims to 128 multiples (NOT the K dim),
    and cast weights to bf16. Padded class columns get a large negative bias so padded logits
    are inert for softmax/argmax consumers."""
    w1, b1 = params["w1"], params["b1"]
    gamma, beta = params["gamma"], params["beta"]
    mean, var = params["run_mean"], params["run_var"]
    w2, b2 = params["w2"], params["b2"]

    num_bottleneck, input_dim = w1.shape
    class_num = w2.shape[0]

    inv_std = 1.0 / jnp.sqrt(var + eps)
    scale = gamma * inv_std
    shift = beta - mean * scale

    # (x @ W1^T + b1) * scale + shift  ==  x @ (W1^T * scale) + (b1 * scale + shift)
    w1_fold = w1.T * scale[None, :]            # (input_dim, num_bottleneck)
    b1_fold = b1 * scale + shift               # (num_bottleneck,)
    w2_t = w2.T                                # (num_bottleneck, class_num)

    n1_pad = _round_up(num_bottleneck, 128)
    c_pad = _round_up(class_num, 128)

    w1_fold = jnp.pad(w1_fold, ((0, 0), (0, n1_pad - num_bottleneck)))
    b1_fold = jnp.pad(b1_fold, (0, n1_pad - num_bottleneck))
    w2_t = jnp.pad(w2_t, ((0, n1_pad - num_bottleneck), (0, c_pad - class_num)))
    b2_p = jnp.pad(b2, (0, c_pad - class_num), constant_values=class_pad_bias)

    return dict(
        w1_fold=w1_fold.astype(jnp.bfloat16),               # (input_dim, n1_pad)
        b1_fold=b1_fold.reshape(1, n1_pad).astype(jnp.float32),
        w2_t=w2_t.astype(jnp.bfloat16),                      # (n1_pad, c_pad)
        b2=b2_p.reshape(1, c_pad).astype(jnp.float32),
    )


def classblock_forward(x, prepared, *, class_num, batch_tile=512,
                       out_dtype=jnp.float32, return_padded=False):
    """x: (B, input_dim) float32.  prepared: output of prepare_classblock_params.
    Returns logits (B, class_num) in out_dtype (or the padded (b_pad, c_pad) slab if
    return_padded=True; padded class columns carry -1e30 bias so they are inert)."""
    w1 = prepared["w1_fold"]
    b1 = prepared["b1_fold"]
    w2 = prepared["w2_t"]
    b2 = prepared["b2"]

    B, input_dim = x.shape
    k_dim, n1_pad = w1.shape
    assert k_dim == input_dim, "prepared params do not match x's input_dim"
    _, c_pad = w2.shape

    tile, b_pad = _choose_batch_tile(B, batch_tile)
    k_block = _choose_k_block(input_dim)
    grid_b = b_pad // tile
    grid_k = input_dim // k_block

    if b_pad != B:
        # Padding forces a copy anyway -> make it bf16 so the copy + kernel re-read is
        # half the bytes of an f32 padded copy.
        x_in = jnp.pad(x.astype(jnp.bfloat16), ((0, b_pad - B), (0, 0)))
    else:
        # No copy: f32 x goes straight into the kernel and is cast there.
        x_in = x

    out_itemsize = jnp.dtype(out_dtype).itemsize

    # Resident operands: constant index_maps -> single buffer. W1 is only tiled when grid_k > 1.
    w1_mode = pl.Buffered(1) if grid_k == 1 else pl.Buffered(2)
    resident = pl.Buffered(1)

    # VMEM footprint (double-buffered streaming operands, single-buffered residents) + headroom.
    vmem_bytes = (
        2 * tile * k_block * x_in.dtype.itemsize        # x tile (pipelined)
        + 2 * tile * c_pad * out_itemsize               # out tile (pipelined)
        + (1 if grid_k == 1 else 2) * k_block * n1_pad * w1.dtype.itemsize
        + n1_pad * c_pad * w2.dtype.itemsize            # W2^T resident
        + (n1_pad + c_pad) * 4                          # biases
        + tile * n1_pad * 4                             # f32 accumulator scratch
    )
    vmem_limit = min(max(int(vmem_bytes * 1.5) + (2 << 20), 16 << 20), 128 << 20)

    cost = pl.CostEstimate(
        flops=2 * b_pad * (input_dim * n1_pad + n1_pad * c_pad),
        transcendentals=0,
        bytes_accessed=int(
            b_pad * input_dim * x_in.dtype.itemsize
            + w1.size * w1.dtype.itemsize + w2.size * w2.dtype.itemsize
            + (b1.size + b2.size) * 4
            + b_pad * c_pad * out_itemsize),
    )

    out = pl.pallas_call(
        classblock_kernel,
        out_shape=jax.ShapeDtypeStruct((b_pad, c_pad), out_dtype),
        grid_spec=pltpu.PrefetchScalarGridSpec(
            num_scalar_prefetch=0,
            grid=(grid_b, grid_k),
            in_specs=[
                pl.BlockSpec((tile, k_block), lambda i, k: (i, k)),                       # x tile
                pl.BlockSpec((k_block, n1_pad), lambda i, k: (k, 0), pipeline_mode=w1_mode),  # folded W1
                pl.BlockSpec((1, n1_pad), lambda i, k: (0, 0), pipeline_mode=resident),   # folded bias
                pl.BlockSpec((n1_pad, c_pad), lambda i, k: (0, 0), pipeline_mode=resident),  # W2^T
                pl.BlockSpec((1, c_pad), lambda i, k: (0, 0), pipeline_mode=resident),    # b2
            ],
            out_specs=pl.BlockSpec((tile, c_pad), lambda i, k: (i, 0)),
            scratch_shapes=[pltpu.VMEM((tile, n1_pad), jnp.float32)],
        ),
        compiler_params=pltpu.CompilerParams(
            dimension_semantics=("parallel", "arbitrary"),
            vmem_limit_bytes=vmem_limit,
        ),
        cost_estimate=cost,
    )(x_in, w1, b1, w2, b2)

    if return_padded:
        return out
    return out[:B, :class_num]


def init_params(key, input_dim, num_bottleneck, class_num):
    k1, k2, k3 = jax.random.split(key, 3)
    # nn.Linear(input_dim, num_bottleneck): kaiming_normal_ mode='fan_out', a=0 -> std = sqrt(2/out)
    std1 = (2.0 / num_bottleneck) ** 0.5
    w1 = std1 * jax.random.normal(k1, (num_bottleneck, input_dim), jnp.float32)
    b1 = jnp.zeros((num_bottleneck,), jnp.float32)
    # BatchNorm1d: weight ~ N(1.0, 0.02), bias = 0, running stats at init values.
    gamma = 1.0 + 0.02 * jax.random.normal(k2, (num_bottleneck,), jnp.float32)
    beta = jnp.zeros((num_bottleneck,), jnp.float32)
    run_mean = jnp.zeros((num_bottleneck,), jnp.float32)
    run_var = jnp.ones((num_bottleneck,), jnp.float32)
    # Classifier nn.Linear(num_bottleneck, class_num): weight ~ N(0, 0.001), bias = 0.
    w2 = 0.001 * jax.random.normal(k3, (class_num, num_bottleneck), jnp.float32)
    b2 = jnp.zeros((class_num,), jnp.float32)
    return dict(w1=w1, b1=b1, gamma=gamma, beta=beta,
                run_mean=run_mean, run_var=run_var, w2=w2, b2=b2)


def classblock_reference(x, params):
    eps = 1e-5
    h = x @ params["w1"].T + params["b1"]
    bn = (h - params["run_mean"]) / jnp.sqrt(params["run_var"] + eps)
    bn = bn * params["gamma"] + params["beta"]
    return bn @ params["w2"].T + params["b2"]


if __name__ == "__main__":
    # Small shapes consistent with ClassBlock(input_dim, class_num=751, droprate).
    # class_num=751 (non-128-multiple) exercises the lane-dense output padding path.
    B, INPUT_DIM, NUM_BOTTLENECK, CLASS_NUM = 8, 64, 256, 751

    key = jax.random.PRNGKey(0)
    kx, kp = jax.random.split(key)
    x = jax.random.normal(kx, (B, INPUT_DIM), jnp.float32)
    params = init_params(kp, INPUT_DIM, NUM_BOTTLENECK, CLASS_NUM)

    # Fold BN + transpose + pad + bf16-cast once, outside the forward hot path.
    prepared = prepare_classblock_params(params)
    ref = classblock_reference(x, params)

    # Default path: f32 logits, sliced back to (B, class_num).
    fwd = jax.jit(functools.partial(classblock_forward, class_num=CLASS_NUM))
    out = jax.block_until_ready(fwd(x, prepared))
    assert out.shape == (B, CLASS_NUM)
    # bf16 matmuls with f32 accumulation: slightly looser tolerance than pure f32.
    assert jnp.allclose(out, ref, atol=5e-3, rtol=3e-2), "mismatch vs reference (f32 out)"

    # v6e-oriented path: bf16 logits, padded slab returned directly (no unpad slice);
    # padded class columns carry -1e30 bias so they are inert for softmax/argmax.
    fwd_bf16 = jax.jit(functools.partial(classblock_forward, class_num=CLASS_NUM,
                                         out_dtype=jnp.bfloat16, return_padded=True))
    out_p = jax.block_until_ready(fwd_bf16(x, prepared))
    assert out_p.shape == (B, _round_up(CLASS_NUM, 128)) and out_p.dtype == jnp.bfloat16
    assert jnp.allclose(out_p[:B, :CLASS_NUM].astype(jnp.float32), ref,
                        atol=1e-2, rtol=5e-2), "mismatch vs reference (bf16 out)"

    print("KERNEL_OK")
</pallas_src>

<mosaic_0001>
module attributes {stable_mosaic.version = 11 : i64} {
  func.func @classblock_kernel(%arg0: i32, %arg1: i32, %arg2: memref<8x64xf32, #tpu.memory_space<vmem>>, %arg3: memref<64x256xbf16, #tpu.memory_space<vmem>>, %arg4: memref<1x256xf32, #tpu.memory_space<vmem>>, %arg5: memref<256x768xbf16, #tpu.memory_space<vmem>>, %arg6: memref<1x768xf32, #tpu.memory_space<vmem>>, %arg7: memref<8x768xf32, #tpu.memory_space<vmem>>, %arg8: memref<8x256xf32, #tpu.memory_space<vmem>>) attributes {dimension_semantics = [#tpu.dimension_semantics<parallel>, #tpu.dimension_semantics<arbitrary>], iteration_bounds = array<i64: 1, 1>, scalar_prefetch = 0 : i64, scratch_operands = 1 : i64, tpu.core_type = #tpu.core_type<tc>, window_params = [{transform_indices = @transform_0, window_bounds = array<i64: 8, 64>}, {pipeline_mode = #tpu.pipeline_mode<synchronous>, transform_indices = @transform_1, window_bounds = array<i64: 64, 256>}, {pipeline_mode = #tpu.pipeline_mode<synchronous>, transform_indices = @transform_2, window_bounds = array<i64: 1, 256>}, {pipeline_mode = #tpu.pipeline_mode<synchronous>, transform_indices = @transform_3, window_bounds = array<i64: 256, 768>}, {pipeline_mode = #tpu.pipeline_mode<synchronous>, transform_indices = @transform_4, window_bounds = array<i64: 1, 768>}, {transform_indices = @transform_5, window_bounds = array<i64: 8, 768>}]} {
    %c0_i32 = arith.constant 0 : i32
    %0 = arith.cmpi eq, %arg1, %c0_i32 : i32
    %1 = arith.extui %0 : i1 to i32
    %c0_i32_0 = arith.constant 0 : i32
    %2 = arith.cmpi ne, %1, %c0_i32_0 : i32
    scf.if %2 {
      %cst_10 = arith.constant 0.000000e+00 : f32
      %13 = vector.broadcast %cst_10 : f32 to vector<8x256xf32>
      %c0_11 = arith.constant 0 : index
      %c0_12 = arith.constant 0 : index
      %14 = vector.load %arg8[%c0_11, %c0_12] : memref<8x256xf32, #tpu.memory_space<vmem>>, vector<8x256xf32>
      tpu.vector_store %arg8[%c0_11, %c0_12], %13 {strides = array<i32>} : memref<8x256xf32, #tpu.memory_space<vmem>>, vector<8x256xf32>,
    } else {
    }
    %c0 = arith.constant 0 : index
    %c0_1 = arith.constant 0 : index
    %3 = vector.load %arg8[%c0, %c0_1] : memref<8x256xf32, #tpu.memory_space<vmem>>, vector<8x256xf32>
    %c0_2 = arith.constant 0 : index
    %c0_3 = arith.constant 0 : index
    %4 = vector.load %arg2[%c0_2, %c0_3] : memref<8x64xf32, #tpu.memory_space<vmem>>, vector<8x64xf32>
    %5 = arith.truncf %4 : vector<8x64xf32> to vector<8x64xbf16>
    %c0_4 = arith.constant 0 : index
    %c0_5 = arith.constant 0 : index
    %6 = vector.load %arg3[%c0_4, %c0_5] : memref<64x256xbf16, #tpu.memory_space<vmem>>, vector<64x256xbf16>
    %cst = arith.constant dense<0.000000e+00> : vector<8x256xf32>
    %7 = tpu.matmul %5, %6, %cst {dimension_numbers = #tpu.dot_dimension_numbers<[1], [0], [0], [1], [0, 0, 1, 1], [], []>} : vector<8x64xbf16>, vector<64x256xbf16>, vector<8x256xf32> -> vector<8x256xf32>
    %8 = arith.addf %3, %7 : vector<8x256xf32>
    %c0_6 = arith.constant 0 : index
    %c0_7 = arith.constant 0 : index
    %9 = vector.load %arg8[%c0_6, %c0_7] : memref<8x256xf32, #tpu.memory_space<vmem>>, vector<8x256xf32>
    tpu.vector_store %arg8[%c0_6, %c0_7], %8 {strides = array<i32>} : memref<8x256xf32, #tpu.memory_space<vmem>>, vector<8x256xf32>,
    %c0_i32_8 = arith.constant 0 : i32
    %10 = arith.cmpi eq, %arg1, %c0_i32_8 : i32
    %11 = arith.extui %10 : i1 to i32
    %c0_i32_9 = arith.constant 0 : i32
    %12 = arith.cmpi ne, %11, %c0_i32_9 : i32
    scf.if %12 {
      %c0_10 = arith.constant 0 : index
      %c0_11 = arith.constant 0 : index
      %13 = vector.load %arg8[%c0_10, %c0_11] : memref<8x256xf32, #tpu.memory_space<vmem>>, vector<8x256xf32>
      %c0_12 = arith.constant 0 : index
      %c0_13 = arith.constant 0 : index
      %14 = vector.load %arg4[%c0_12, %c0_13] : memref<1x256xf32, #tpu.memory_space<vmem>>, vector<1x256xf32>
      %15 = vector.broadcast %14 : vector<1x256xf32> to vector<8x256xf32>
      %16 = arith.addf %13, %15 : vector<8x256xf32>
      %17 = arith.truncf %16 : vector<8x256xf32> to vector<8x256xbf16>
      %c0_14 = arith.constant 0 : index
      %c0_15 = arith.constant 0 : index
      %18 = vector.load %arg5[%c0_14, %c0_15] : memref<256x768xbf16, #tpu.memory_space<vmem>>, vector<256x768xbf16>
      %cst_16 = arith.constant dense<0.000000e+00> : vector<8x768xf32>
      %19 = tpu.matmul %17, %18, %cst_16 {dimension_numbers = #tpu.dot_dimension_numbers<[1], [0], [0], [1], [0, 0, 1, 1], [], []>} : vector<8x256xbf16>, vector<256x768xbf16>, vector<8x768xf32> -> vector<8x768xf32>
      %c0_17 = arith.constant 0 : index
      %c0_18 = arith.constant 0 : index
      %20 = vector.load %arg6[%c0_17, %c0_18] : memref<1x768xf32, #tpu.memory_space<vmem>>, vector<1x768xf32>
      %21 = vector.broadcast %20 : vector<1x768xf32> to vector<8x768xf32>
      %22 = arith.addf %19, %21 : vector<8x768xf32>
      %c0_19 = arith.constant 0 : index
      %c0_20 = arith.constant 0 : index
      %23 = vector.load %arg7[%c0_19, %c0_20] : memref<8x768xf32, #tpu.memory_space<vmem>>, vector<8x768xf32>
      tpu.vector_store %arg7[%c0_19, %c0_20], %22 {strides = array<i32>} : memref<8x768xf32, #tpu.memory_space<vmem>>, vector<8x768xf32>,
    } else {
    }
    return
  }
  func.func @transform_0(%arg0: i32, %arg1: i32) -> (i32, i32) {
    %c0_i32 = arith.constant 0 : i32
    return %arg0, %arg1 : i32, i32
  }
  func.func @transform_1(%arg0: i32, %arg1: i32) -> (i32, i32) {
    %c0_i32 = arith.constant 0 : i32
    %c0_i32_0 = arith.constant 0 : i32
    return %arg1, %c0_i32 : i32, i32
  }
  func.func @transform_2(%arg0: i32, %arg1: i32) -> (i32, i32) {
    %c0_i32 = arith.constant 0 : i32
    %c0_i32_0 = arith.constant 0 : i32
    %c0_i32_1 = arith.constant 0 : i32
    return %c0_i32, %c0_i32_0 : i32, i32
  }
  func.func @transform_3(%arg0: i32, %arg1: i32) -> (i32, i32) {
    %c0_i32 = arith.constant 0 : i32
    %c0_i32_0 = arith.constant 0 : i32
    %c0_i32_1 = arith.constant 0 : i32
    return %c0_i32, %c0_i32_0 : i32, i32
  }
  func.func @transform_4(%arg0: i32, %arg1: i32) -> (i32, i32) {
    %c0_i32 = arith.constant 0 : i32
    %c0_i32_0 = arith.constant 0 : i32
    %c0_i32_1 = arith.constant 0 : i32
    return %c0_i32, %c0_i32_0 : i32, i32
  }
  func.func @transform_5(%arg0: i32, %arg1: i32) -> (i32, i32) {
    %c0_i32 = arith.constant 0 : i32
    %c0_i32_0 = arith.constant 0 : i32
    return %arg0, %c0_i32 : i32, i32
  }
}

</mosaic_0001>

<bundles_post_ra>
// kernel: classblock_forward.1
= control target key start
LH: loop header
LB: loop body
LE: loop exit
PB: predicated region body
PF: predicated region fallthrough
CT: control target
= control target key end

     0   :  { %10 = vsyncpa [#allocation4], 0  ;;  %s1732_s0 = inlined_call_operand.hbm [shape: f32[8,64], index: 0, kind: input, shape index: {}]   ;;  %s1733_s1 = inlined_call_operand.hbm [shape: bf16[64,256], index: 1, kind: input, shape index: {}]   ;;  %s1734_s2 = inlined_call_operand.hbm [shape: f32[1,256], index: 2, kind: input, shape index: {}]   ;;  %s1735_s3 = inlined_call_operand.hbm [shape: bf16[256,768], index: 3, kind: input, shape index: {}]   ;;  %s1736_s4 = inlined_call_operand.hbm [shape: f32[1,768], index: 4, kind: input, shape index: {}]   ;;  %s1737_s5 = inlined_call_operand.hbm [shape: f32[8,768], index: 5, kind: output, shape index: {}]  }
   0x1   :  { %11 = vsyncpa [#allocation7], 0 }
   0x2   :  { %12 = vsyncpa [#allocation10], 0  ;;  %s29_s20 = sshll.u32 %s1733_s1, 4  ;;  %s30_s20 = int_to_ptr.hbm [resolvable:$true] %s29_s20 }
   0x3   :  { %13 = vsyncpa [#allocation5], 0  ;;  %s1656_s21 = smov [#allocation6]   ;;  %s53_s25 = sshll.u32 %s1735_s3, 4  ;;  %s54_s25 = int_to_ptr.hbm [resolvable:$true] %s53_s25 }
   0x4   :  { %s31_s22 = sshll.u32 %s1656_s21, 4  ;;  %s1657_s26 = smov 128   ;;  %s32_s22 = int_to_ptr.vmem [resolvable:$true] %s31_s22 }
   0x5   :  { %s1658_s27 = smov 8   ;;  %s1659_s28 = smov [#allocation9]  }
   0x6   :  { %37 = dma.hbm_to_vmem [thread:$0]  %s30_s20, 1024, %s32_s22, [#allocation7], %s1657_s26, %s1657_s26, %s1658_s27  }
   0x7   :  { %s55_s29 = sshll.u32 %s1659_s28, 4  ;;  %s1660_s30 = smov 384   ;;  %s56_s29 = int_to_ptr.vmem [resolvable:$true] %s55_s29 }
   0x8   :  { %s1661_s6 = smov 24   ;;  %s19_s8 = sshll.u32 %s1732_s0, 4  ;;  %s20_s8 = int_to_ptr.hbm [resolvable:$true] %s19_s8 }
   0x9   :  { %61 = dma.hbm_to_vmem [thread:$0]  %s54_s25, 12288, %s56_s29, [#allocation10], %s1660_s30, %s1660_s30, %s1661_s6  }
   0xa   :  { %s1662_s9 = smov [#allocation3]   ;;  %s43_s12 = sshll.u32 %s1734_s2, 4  ;;  %s44_s12 = int_to_ptr.hbm [resolvable:$true] %s43_s12 }
   0xb   :  { %s21_s10 = sshll.u32 %s1662_s9, 4  ;;  %s1663_s13 = smov [#allocation8]   ;;  %s22_s10 = int_to_ptr.vmem [resolvable:$true] %s21_s10 }
   0xc   :  { %24 = dma.hbm_to_vmem [thread:$0]  %s20_s8, 128, %s22_s10, [#allocation4]  }
   0xd   :  { %s45_s14 = sshll.u32 %s1663_s13, 4  ;;  %s67_s17 = sshll.u32 %s1736_s4, 4  ;;  %s46_s14 = int_to_ptr.vmem [resolvable:$true] %s45_s14  ;;  %s68_s17 = int_to_ptr.hbm [resolvable:$true] %s67_s17 }
   0xe   :  { %48 = dma.hbm_to_vmem [thread:$0]  %s44_s12, 32, %s46_s14, [#allocation7]  }
   0xf   :  { %s1664_s0 = smov [#allocation11]  }
  0x10   :  { %s69_s18 = sshll.u32 %s1664_s0, 4  ;;  %s70_s18 = int_to_ptr.vmem [resolvable:$true] %s69_s18 }
  0x11   :  { %72 = dma.hbm_to_vmem [thread:$0]  %s68_s17, 96, %s70_s18, [#allocation10]  }
  0x12   :  { %1648 = dma.done.wait [#allocation4], 128  }
  0x13   :  { %1649 = vsyncadd [#allocation4], 4294967168 }
  0x14   :  { %1650 = dma.done.wait [#allocation7], 1056  }
  0x15   :  { %1651 = vsyncadd [#allocation7], 4294966240 }
  0x16   :  { %1652 = dma.done.wait [#allocation10], 12384  }
  0x17   :  { %1653 = vsyncadd [#allocation10], 4294954912  ;;  %v998_v0 = vld [vmem:[#allocation6 + $0x30] sm:$0xf]  ;;  %v1397_v1 = vld [vmem:[#allocation6 + $0x34] sm:$0xf0] }
  0x18   :  { %v1396_v2 = vld [vmem:[#allocation6 + $0x34] sm:$0xf]  ;;  %v999_v3 = vor.u32 %v1397_v1, %v998_v0  ;;  %v1000_v4 = vld [vmem:[#allocation6 + $0x38] sm:$0xf0]  ;;  %v990_v5 = vld [vmem:[#allocation6 + $0x20] sm:$0xf] }
  0x19   :  { %v1395_v6 = vld [vmem:[#allocation6 + $0x24] sm:$0xf0]  ;;  %v1003_v7 = vor.u32 %v1396_v2, %v1000_v4  ;;  %v1394_v8 = vld [vmem:[#allocation6 + $0x24] sm:$0xf]  ;;  %v992_v9 = vld [vmem:[#allocation6 + $0x28] sm:$0xf0] }
  0x1a   :  { %160 = vmatpush.bf16.msra.mxu0 %v999_v3  ;;  %v991_v10 = vor.u32 %v1395_v6, %v990_v5  ;;  %v995_v11 = vor.u32 %v1394_v8, %v992_v9  ;;  %v982_v12 = vld [vmem:[#allocation6 + $0x10] sm:$0xf]  ;;  %v1393_v13 = vld [vmem:[#allocation6 + $0x14] sm:$0xf0]  ;;  %v1392_v14 = vld [vmem:[#allocation6 + $0x14] sm:$0xf] }
  0x1b   :  { %173 = vmatpush.bf16.msra.mxu1 %v1003_v7  ;;  %v984_v15 = vld [vmem:[#allocation6 + $0x18] sm:$0xf0]  ;;  %v1176_v16 = vld [vmem:[#allocation9 + $0x150] sm:$0xf]  ;;  %v974_v17 = vld [vmem:[#allocation6] sm:$0xf]  ;;  %v983_v21 = vor.u32 %v1393_v13, %v982_v12 }
  0x1c   :  { %v1443_v18 = vld [vmem:[#allocation9 + $0x164] sm:$0xf0]  ;;  %v1368_v19 = vld [vmem:[#allocation9 + $0x2d0] sm:$0xf]  ;;  %v1390_v23 = vld [vmem:[#allocation6 + $0x4] sm:$0xf]  ;;  %v987_v27 = vor.u32 %v1392_v14, %v984_v15 }
  0x1d   :  { %v1491_v20 = vld [vmem:[#allocation9 + $0x2e4] sm:$0xf0]  ;;  %v1177_v25 = vor.u32 %v1443_v18, %v1176_v16  ;;  %v1440_v28 = vld [vmem:[#allocation9 + $0x154] sm:$0xf]  ;;  %v1152_v29 = vld [vmem:[#allocation9 + $0x120] sm:$0xf] }
  0x1e   :  { %161 = vmatpush.bf16.msra.mxu0 %v991_v10  ;;  %v1391_v22 = vld [vmem:[#allocation6 + $0x4] sm:$0xf0]  ;;  %v976_v24 = vld [vmem:[#allocation6 + $0x8] sm:$0xf0]  ;;  %v1369_v26 = vor.u32 %v1491_v20, %v1368_v19  ;;  %v1437_v30 = vld [vmem:[#allocation9 + $0x134] sm:$0xf0] }
  0x1f   :  { %174 = vmatpush.bf16.msra.mxu1 %v995_v11  ;;  %791 = vmatpush.bf16.msra.mxu2 %v1177_v25  ;;  %v1178_v31 = vld [vmem:[#allocation9 + $0x168] sm:$0xf0]  ;;  %v1153_v32 = vor.u32 %v1437_v30, %v1152_v29  ;;  %v1344_v33 = vld [vmem:[#allocation9 + $0x2a0] sm:$0xf]  ;;  %v1485_v34 = vld [vmem:[#allocation9 + $0x2b4] sm:$0xf0]  ;;  %v975_v39 = vor.u32 %v1391_v22, %v974_v17  ;;  %v979_v43 = vor.u32 %v1390_v23, %v976_v24 }
  0x20   :  { %804 = vmatpush.bf16.msra.mxu3 %v1369_v26  ;;  %v102_v35 = vld [vmem:[#allocation3] sm:$0xff]  ;;  %v1370_v37 = vld [vmem:[#allocation9 + $0x2e8] sm:$0xf0]  ;;  %v1345_v38 = vor.u32 %v1485_v34, %v1344_v33  ;;  %v1128_v40 = vld [vmem:[#allocation9 + $0xf0] sm:$0xf]  ;;  %v1181_v44 = vor.u32 %v1440_v28, %v1178_v31  ;;  %vm152_vm0 = vcmask 523264  }
  0x21   :  { %v1488_v36 = vld [vmem:[#allocation9 + $0x2d4] sm:$0xf]  ;;  %v1431_v41 = vld [vmem:[#allocation9 + $0x104] sm:$0xf0]  ;;  %v1320_v42 = vld [vmem:[#allocation9 + $0x270] sm:$0xf]  ;;  %v103_v51 = vpack.c.bf16 %v102_v35, %v102_v35 }
  0x22   :  { %162 = vmatpush.bf16.msra.mxu0 %v983_v21  ;;  %v1479_v45 = vld [vmem:[#allocation9 + $0x284] sm:$0xf0]  ;;  %v1373_v46 = vor.u32 %v1488_v36, %v1370_v37  ;;  %v1434_v47 = vld [vmem:[#allocation9 + $0x124] sm:$0xf]  ;;  %v1154_v48 = vld [vmem:[#allocation9 + $0x138] sm:$0xf0]  ;;  %v1129_v50 = vor.u32 %v1431_v41, %v1128_v40 }
  0x23   :  { %175 = vmatpush.bf16.msra.mxu1 %v987_v27  ;;  %792 = vmatpush.bf16.msra.mxu2 %v1153_v32  ;;  %v1482_v49 = vld [vmem:[#allocation9 + $0x2a4] sm:$0xf]  ;;  %v1346_v52 = vld [vmem:[#allocation9 + $0x2b8] sm:$0xf0]  ;;  %v1321_v53 = vor.u32 %v1479_v45, %v1320_v42  ;;  %v1104_v54 = vld [vmem:[#allocation9 + $0xc0] sm:$0xf]  ;;  %v1157_v58 = vor.u32 %v1434_v47, %v1154_v48 }
  0x24   :  { %805 = vmatpush.bf16.msra.mxu3 %v1345_v38  ;;  %v1425_v55 = vld [vmem:[#allocation9 + $0xd4] sm:$0xf0]  ;;  %v1296_v56 = vld [vmem:[#allocation9 + $0x240] sm:$0xf]  ;;  %v1349_v59 = vor.u32 %v1482_v49, %v1346_v52  ;;  %v1428_v60 = vld [vmem:[#allocation9 + $0xf4] sm:$0xf] }
  0x25   :  { %v1473_v57 = vld [vmem:[#allocation9 + $0x254] sm:$0xf0]  ;;  %v1130_v61 = vld [vmem:[#allocation9 + $0x108] sm:$0xf0]  ;;  %v1476_v62 = vld [vmem:[#allocation9 + $0x274] sm:$0xf]  ;;  %v1105_v63 = vor.u32 %v1425_v55, %v1104_v54 }
  0x26   :  { %163 = vmatpush.bf16.msra.mxu0 %v975_v39  ;;  %v1322_v0 = vld [vmem:[#allocation9 + $0x288] sm:$0xf0]  ;;  %v1297_v1 = vor.u32 %v1473_v57, %v1296_v56  ;;  %v1080_v2 = vld [vmem:[#allocation9 + $0x90] sm:$0xf]  ;;  %v1419_v3 = vld [vmem:[#allocation9 + $0xa4] sm:$0xf0]  ;;  %v1133_v6 = vor.u32 %v1428_v60, %v1130_v61 }
  0x27   :  { %176 = vmatpush.bf16.msra.mxu1 %v979_v43  ;;  %793 = vmatpush.bf16.msra.mxu2 %v1129_v50  ;;  %v1272_v4 = vld [vmem:[#allocation9 + $0x210] sm:$0xf]  ;;  %v1467_v5 = vld [vmem:[#allocation9 + $0x224] sm:$0xf0]  ;;  %v1325_v7 = vor.u32 %v1476_v62, %v1322_v0  ;;  %v1422_v8 = vld [vmem:[#allocation9 + $0xc4] sm:$0xf]  ;;  %v1081_v11 = vor.u32 %v1419_v3, %v1080_v2 }
  0x28   :  { %806 = vmatpush.bf16.msra.mxu3 %v1321_v53  ;;  %v1106_v9 = vld [vmem:[#allocation9 + $0xd8] sm:$0xf0]  ;;  %v1470_v10 = vld [vmem:[#allocation9 + $0x244] sm:$0xf]  ;;  %v1273_v13 = vor.u32 %v1467_v5, %v1272_v4  ;;  %v1056_v14 = vld [vmem:[#allocation9 + $0x60] sm:$0xf] }
  0x29   :  { %1004 = vmatmul.msk.bf16.vlgmr.msra.gmra.mxu0 %vm152_vm0, %v103_v51  ;;  %v1298_v12 = vld [vmem:[#allocation9 + $0x258] sm:$0xf0]  ;;  %v1413_v15 = vld [vmem:[#allocation9 + $0x74] sm:$0xf0]  ;;  %v1248_v16 = vld [vmem:[#allocation9 + $0x1e0] sm:$0xf]  ;;  %v1109_v18 = vor.u32 %v1422_v8, %v1106_v9 }
  0x2a   :  { %817 = vmatpush.bf16.msrb.mxu0 %v1181_v44  ;;  %1005 = vmatmul.msk.bf16.vlgmr.msra.gmra.mxu1 %vm152_vm0, %v103_v51  ;;  %v1461_v17 = vld [vmem:[#allocation9 + $0x1f4] sm:$0xf0]  ;;  %v1301_v19 = vor.u32 %v1470_v10, %v1298_v12  ;;  %v1416_v20 = vld [vmem:[#allocation9 + $0x94] sm:$0xf]  ;;  %v1082_v21 = vld [vmem:[#allocation9 + $0xa8] sm:$0xf0]  ;;  %v1057_v23 = vor.u32 %v1413_v15, %v1056_v14 }
  0x2b   :  { %830 = vmatpush.bf16.msrb.mxu1 %v1373_v46  ;;  %794 = vmatpush.bf16.msra.mxu2 %v1105_v63  ;;  %v1464_v22 = vld [vmem:[#allocation9 + $0x214] sm:$0xf]  ;;  %v1274_v24 = vld [vmem:[#allocation9 + $0x228] sm:$0xf0]  ;;  %v1249_v25 = vor.u32 %v1461_v17, %v1248_v16  ;;  %v1032_v26 = vld [vmem:[#allocation9 + $0x30] sm:$0xf]  ;;  %v1085_v30 = vor.u32 %v1416_v20, %v1082_v21 }
  0x2c   :  { %807 = vmatpush.bf16.msra.mxu3 %v1297_v1  ;;  %v1407_v27 = vld [vmem:[#allocation9 + $0x44] sm:$0xf0]  ;;  %v1224_v28 = vld [vmem:[#allocation9 + $0x1b0] sm:$0xf]  ;;  %v1410_v31 = vld [vmem:[#allocation9 + $0x64] sm:$0xf]  ;;  %v1277_v32 = vor.u32 %v1464_v22, %v1274_v24 }
  0x2d   :  { %v1455_v29 = vld [vmem:[#allocation9 + $0x1c4] sm:$0xf0]  ;;  %v1058_v33 = vld [vmem:[#allocation9 + $0x78] sm:$0xf0]  ;;  %v1458_v34 = vld [vmem:[#allocation9 + $0x1e4] sm:$0xf]  ;;  %v1033_v36 = vor.u32 %v1407_v27, %v1032_v26 }
  0x2e   :  { %818 = vmatpush.bf16.msrb.mxu0 %v1157_v58  ;;  %v1250_v35 = vld [vmem:[#allocation9 + $0x1f8] sm:$0xf0]  ;;  %v1225_v37 = vor.u32 %v1455_v29, %v1224_v28  ;;  %v1008_v38 = vld [vmem:[#allocation9] sm:$0xf]  ;;  %v1401_v39 = vld [vmem:[#allocation9 + $0x14] sm:$0xf0]  ;;  %v1061_v44 = vor.u32 %v1410_v31, %v1058_v33 }
  0x2f   :  { %831 = vmatpush.bf16.msrb.mxu1 %v1349_v59  ;;  %795 = vmatpush.bf16.msra.mxu2 %v1081_v11  ;;  %v1200_v40 = vld [vmem:[#allocation9 + $0x180] sm:$0xf]  ;;  %v1449_v41 = vld [vmem:[#allocation9 + $0x194] sm:$0xf0]  ;;  %v1444_v43 = vld [vmem:[#allocation9 + $0x16c] sm:$0xf0]  ;;  %v1253_v47 = vor.u32 %v1458_v34, %v1250_v35  ;;  %v1009_v50 = vor.u32 %v1401_v39, %v1008_v38 }
  0x30   :  { %808 = vmatpush.bf16.msra.mxu3 %v1273_v13  ;;  %v1184_v42 = vld [vmem:[#allocation9 + $0x158] sm:$0xf]  ;;  %v1492_v46 = vld [vmem:[#allocation9 + $0x2ec] sm:$0xf0]  ;;  %v1404_v48 = vld [vmem:[#allocation9 + $0x34] sm:$0xf]  ;;  %v1201_v53 = vor.u32 %v1449_v41, %v1200_v40 }
  0x31   :  { %v1376_v45 = vld [vmem:[#allocation9 + $0x2d8] sm:$0xf]  ;;  %v1034_v49 = vld [vmem:[#allocation9 + $0x48] sm:$0xf0]  ;;  %v1452_v51 = vld [vmem:[#allocation9 + $0x1b4] sm:$0xf]  ;;  %v1185_v54 = vor.u32 %v1444_v43, %v1184_v42 }
  0x32   :  { %819 = vmatpush.bf16.msrb.mxu0 %v1133_v6  ;;  %v1226_v52 = vld [vmem:[#allocation9 + $0x1c8] sm:$0xf0]  ;;  %v1377_v55 = vor.u32 %v1492_v46, %v1376_v45  ;;  %v1160_v56 = vld [vmem:[#allocation9 + $0x128] sm:$0xf]  ;;  %v1438_v57 = vld [vmem:[#allocation9 + $0x13c] sm:$0xf0]  ;;  %v1037_v58 = vor.u32 %v1404_v48, %v1034_v49 }
  0x33   :  { %832 = vmatpush.bf16.msrb.mxu1 %v1325_v7  ;;  %796 = vmatpush.bf16.msra.mxu2 %v1057_v23  ;;  %v1398_v59 = vld [vmem:[#allocation9 + $0x4] sm:$0xf]  ;;  %v1352_v60 = vld [vmem:[#allocation9 + $0x2a8] sm:$0xf]  ;;  %v1486_v61 = vld [vmem:[#allocation9 + $0x2bc] sm:$0xf0]  ;;  %v1229_v62 = vor.u32 %v1452_v51, %v1226_v52  ;;  %v1161_v5 = vor.u32 %v1438_v57, %v1160_v56 }
  0x34   :  { %809 = vmatpush.bf16.msra.mxu3 %v1249_v25  ;;  %v1010_v63 = vld [vmem:[#allocation9 + $0x18] sm:$0xf0]  ;;  %v1446_v0 = vld [vmem:[#allocation9 + $0x184] sm:$0xf]  ;;  %v1186_v3 = vld [vmem:[#allocation9 + $0x170] sm:$0xf0]  ;;  %v1353_v7 = vor.u32 %v1486_v61, %v1352_v60 }
  0x35   :  { %v1202_v1 = vld [vmem:[#allocation9 + $0x198] sm:$0xf0]  ;;  %v1378_v6 = vld [vmem:[#allocation9 + $0x2f0] sm:$0xf0]  ;;  %v1136_v8 = vld [vmem:[#allocation9 + $0xf8] sm:$0xf]  ;;  %v1013_v10 = vor.u32 %v1398_v59, %v1010_v63 }
  0x36   :  { %820 = vmatpush.bf16.msrb.mxu0 %v1109_v18  ;;  %v1441_v2 = vld [vmem:[#allocation9 + $0x15c] sm:$0xf]  ;;  %v1432_v9 = vld [vmem:[#allocation9 + $0x10c] sm:$0xf0]  ;;  %v1328_v11 = vld [vmem:[#allocation9 + $0x278] sm:$0xf]  ;;  %v1205_v13 = vor.u32 %v1446_v0, %v1202_v1 }
  0x37   :  { %833 = vmatpush.bf16.msrb.mxu1 %v1301_v19  ;;  %797 = vmatpush.bf16.msra.mxu2 %v1033_v36  ;;  %v1489_v4 = vld [vmem:[#allocation9 + $0x2dc] sm:$0xf]  ;;  %v1480_v12 = vld [vmem:[#allocation9 + $0x28c] sm:$0xf0]  ;;  %v1189_v14 = vor.u32 %v1441_v2, %v1186_v3  ;;  %v1435_v16 = vld [vmem:[#allocation9 + $0x12c] sm:$0xf]  ;;  %v1137_v19 = vor.u32 %v1432_v9, %v1136_v8 }
  0x38   :  { %810 = vmatpush.bf16.msra.mxu3 %v1225_v37  ;;  %v1381_v15 = vor.u32 %v1489_v4, %v1378_v6  ;;  %v1162_v17 = vld [vmem:[#allocation9 + $0x140] sm:$0xf0]  ;;  %v1483_v18 = vld [vmem:[#allocation9 + $0x2ac] sm:$0xf]  ;;  %v1329_v21 = vor.u32 %v1480_v12, %v1328_v11  ;;  %v1112_v22 = vld [vmem:[#allocation9 + $0xc8] sm:$0xf] }
  0x39   :  { %v1354_v20 = vld [vmem:[#allocation9 + $0x2c0] sm:$0xf0]  ;;  %v1426_v23 = vld [vmem:[#allocation9 + $0xdc] sm:$0xf0]  ;;  %v1304_v24 = vld [vmem:[#allocation9 + $0x248] sm:$0xf]  ;;  %v1165_v26 = vor.u32 %v1435_v16, %v1162_v17 }
  0x3a   :  { %821 = vmatpush.bf16.msrb.mxu0 %v1085_v30  ;;  %v1474_v25 = vld [vmem:[#allocation9 + $0x25c] sm:$0xf0]  ;;  %v1357_v27 = vor.u32 %v1483_v18, %v1354_v20  ;;  %v1429_v28 = vld [vmem:[#allocation9 + $0xfc] sm:$0xf]  ;;  %v1138_v29 = vld [vmem:[#allocation9 + $0x110] sm:$0xf0]  ;;  %v1113_v31 = vor.u32 %v1426_v23, %v1112_v22 }
  0x3b   :  { %834 = vmatpush.bf16.msrb.mxu1 %v1277_v32  ;;  %798 = vmatpush.bf16.msra.mxu2 %v1009_v50  ;;  %v1477_v30 = vld [vmem:[#allocation9 + $0x27c] sm:$0xf]  ;;  %v1330_v32 = vld [vmem:[#allocation9 + $0x290] sm:$0xf0]  ;;  %v1305_v33 = vor.u32 %v1474_v25, %v1304_v24  ;;  %v1088_v34 = vld [vmem:[#allocation9 + $0x98] sm:$0xf]  ;;  %v1141_v38 = vor.u32 %v1429_v28, %v1138_v29 }
  0x3c   :  { %811 = vmatpush.bf16.msra.mxu3 %v1201_v53  ;;  %v1420_v35 = vld [vmem:[#allocation9 + $0xac] sm:$0xf0]  ;;  %v1280_v36 = vld [vmem:[#allocation9 + $0x218] sm:$0xf]  ;;  %v1333_v39 = vor.u32 %v1477_v30, %v1330_v32  ;;  %v1423_v40 = vld [vmem:[#allocation9 + $0xcc] sm:$0xf] }
  0x3d   :  { %v1468_v37 = vld [vmem:[#allocation9 + $0x22c] sm:$0xf0]  ;;  %v1114_v41 = vld [vmem:[#allocation9 + $0xe0] sm:$0xf0]  ;;  %v1471_v42 = vld [vmem:[#allocation9 + $0x24c] sm:$0xf]  ;;  %v1089_v43 = vor.u32 %v1420_v35, %v1088_v34 }
  0x3e   :  { %822 = vmatpush.bf16.msrb.mxu0 %v1061_v44  ;;  %v1306_v44 = vld [vmem:[#allocation9 + $0x260] sm:$0xf0]  ;;  %v1281_v45 = vor.u32 %v1468_v37, %v1280_v36  ;;  %v1064_v46 = vld [vmem:[#allocation9 + $0x68] sm:$0xf]  ;;  %v1462_v49 = vld [vmem:[#allocation9 + $0x1fc] sm:$0xf0]  ;;  %v1117_v50 = vor.u32 %v1423_v40, %v1114_v41 }
  0x3f   :  { %835 = vmatpush.bf16.msrb.mxu1 %v1253_v47  ;;  %843 = vmatpush.bf16.msrb.mxu2 %v1185_v54  ;;  %v1414_v47 = vld [vmem:[#allocation9 + $0x7c] sm:$0xf0]  ;;  %v1256_v48 = vld [vmem:[#allocation9 + $0x1e8] sm:$0xf]  ;;  %v1309_v51 = vor.u32 %v1471_v42, %v1306_v44  ;;  %v1417_v52 = vld [vmem:[#allocation9 + $0x9c] sm:$0xf] }
  0x40   :  { %856 = vmatpush.bf16.msrb.mxu3 %v1377_v55  ;;  %v1090_v53 = vld [vmem:[#allocation9 + $0xb0] sm:$0xf0]  ;;  %v1065_v54 = vor.u32 %v1414_v47, %v1064_v46  ;;  %v1465_v55 = vld [vmem:[#allocation9 + $0x21c] sm:$0xf]  ;;  %v1257_v57 = vor.u32 %v1462_v49, %v1256_v48  ;;  %v1411_v60 = vld [vmem:[#allocation9 + $0x6c] sm:$0xf] }
  0x41   :  { %v1282_v56 = vld [vmem:[#allocation9 + $0x230] sm:$0xf0]  ;;  %v1066_v61 = vld [vmem:[#allocation9 + $0x80] sm:$0xf0]  ;;  %v1040_v2 = vld [vmem:[#allocation9 + $0x38] sm:$0xf] }
  0x42   :  { %823 = vmatpush.bf16.msrb.mxu0 %v1037_v58  ;;  %v1093_v58 = vor.u32 %v1417_v52, %v1090_v53  ;;  %v1285_v59 = vor.u32 %v1465_v55, %v1282_v56  ;;  %v1258_v63 = vld [vmem:[#allocation9 + $0x200] sm:$0xf0]  ;;  %v1069_v0 = vor.u32 %v1411_v60, %v1066_v61  ;;  %v1408_v3 = vld [vmem:[#allocation9 + $0x4c] sm:$0xf0]  ;;  %v1405_v8 = vld [vmem:[#allocation9 + $0x3c] sm:$0xf] }
  0x43   :  { %836 = vmatpush.bf16.msrb.mxu1 %v1229_v62  ;;  %844 = vmatpush.bf16.msrb.mxu2 %v1161_v5  ;;  %v1459_v62 = vld [vmem:[#allocation9 + $0x1ec] sm:$0xf]  ;;  %v1041_v4 = vor.u32 %v1408_v3, %v1040_v2  ;;  %v1232_v5 = vld [vmem:[#allocation9 + $0x1b8] sm:$0xf]  ;;  %v1456_v6 = vld [vmem:[#allocation9 + $0x1cc] sm:$0xf0] }
  0x44   :  { %857 = vmatpush.bf16.msrb.mxu3 %v1353_v7  ;;  %v1261_v1 = vor.u32 %v1459_v62, %v1258_v63  ;;  %v1233_v7 = vor.u32 %v1456_v6, %v1232_v5  ;;  %v1042_v9 = vld [vmem:[#allocation9 + $0x50] sm:$0xf0]  ;;  %v1208_v16 = vld [vmem:[#allocation9 + $0x188] sm:$0xf]  ;;  %v1450_v18 = vld [vmem:[#allocation9 + $0x19c] sm:$0xf0] }
  0x45   :  { %v1045_v11 = vor.u32 %v1405_v8, %v1042_v9  ;;  %v1234_v12 = vld [vmem:[#allocation9 + $0x1d0] sm:$0xf0]  ;;  %v1018_v20 = vld [vmem:[#allocation9 + $0x20] sm:$0xf0]  ;;  %v1447_v23 = vld [vmem:[#allocation9 + $0x18c] sm:$0xf] }
  0x46   :  { %824 = vmatpush.bf16.msrb.mxu0 %v1013_v10  ;;  %v1453_v10 = vld [vmem:[#allocation9 + $0x1bc] sm:$0xf]  ;;  %v1210_v24 = vld [vmem:[#allocation9 + $0x1a0] sm:$0xf0]  ;;  %v1192_v29 = vld [vmem:[#allocation9 + $0x160] sm:$0xf] }
  0x47   :  { %837 = vmatpush.bf16.msrb.mxu1 %v1205_v13  ;;  %845 = vmatpush.bf16.msrb.mxu2 %v1137_v19  ;;  %v1237_v13 = vor.u32 %v1453_v10, %v1234_v12  ;;  %v1399_v19 = vld [vmem:[#allocation9 + $0xc] sm:$0xf]  ;;  %v1213_v25 = vor.u32 %v1447_v23, %v1210_v24  ;;  %v1445_v30 = vld [vmem:[#allocation9 + $0x174] sm:$0xf0]  ;;  %v1384_v32 = vld [vmem:[#allocation9 + $0x2e0] sm:$0xf] }
  0x48   :  { %858 = vmatpush.bf16.msrb.mxu3 %v1329_v21  ;;  %v1209_v21 = vor.u32 %v1450_v18, %v1208_v16  ;;  %v1021_v22 = vor.u32 %v1399_v19, %v1018_v20  ;;  %v1442_v34 = vld [vmem:[#allocation9 + $0x164] sm:$0xf]  ;;  %v1194_v37 = vld [vmem:[#allocation9 + $0x178] sm:$0xf0]  ;;  %v1193_v42 = vor.u32 %v1445_v30, %v1192_v29  ;;  %v1168_v44 = vld [vmem:[#allocation9 + $0x130] sm:$0xf] }
  0x49   :  { %v1197_v47 = vor.u32 %v1442_v34, %v1194_v37  ;;  %v1360_v49 = vld [vmem:[#allocation9 + $0x2b0] sm:$0xf]  ;;  %v1170_v52 = vld [vmem:[#allocation9 + $0x148] sm:$0xf0]  ;;  %v1484_v53 = vld [vmem:[#allocation9 + $0x2b4] sm:$0xf] }
  0x4a   :  { %869 = vmatpush.bf16.msra.mxu0 %v1189_v14  ;;  %v1016_v14 = vld [vmem:[#allocation9 + $0x8] sm:$0xf]  ;;  %v1336_v62 = vld [vmem:[#allocation9 + $0x280] sm:$0xf]  ;;  %v1481_v63 = vld [vmem:[#allocation9 + $0x294] sm:$0xf0] }
  0x4b   :  { %882 = vmatpush.bf16.msra.mxu1 %v1381_v15  ;;  %846 = vmatpush.bf16.msrb.mxu2 %v1113_v31  ;;  %v1402_v15 = vld [vmem:[#allocation9 + $0x1c] sm:$0xf0]  ;;  %v1146_v2 = vld [vmem:[#allocation9 + $0x118] sm:$0xf0]  ;;  %v1478_v3 = vld [vmem:[#allocation9 + $0x284] sm:$0xf]  ;;  %v1337_v6 = vor.u32 %v1481_v63, %v1336_v62 }
  0x4c   :  { %859 = vmatpush.bf16.msrb.mxu3 %v1305_v33  ;;  %v1017_v17 = vor.u32 %v1402_v15, %v1016_v14  ;;  %v1493_v33 = vld [vmem:[#allocation9 + $0x2f4] sm:$0xf0]  ;;  %v1427_v8 = vld [vmem:[#allocation9 + $0xe4] sm:$0xf0]  ;;  %v1122_v14 = vld [vmem:[#allocation9 + $0xe8] sm:$0xf0] }
  0x4d   :  { %v1475_v12 = vld [vmem:[#allocation9 + $0x264] sm:$0xf0]  ;;  %v1472_v15 = vld [vmem:[#allocation9 + $0x254] sm:$0xf]  ;;  %v1314_v16 = vld [vmem:[#allocation9 + $0x268] sm:$0xf0] }
  0x4e   :  { %870 = vmatpush.bf16.msra.mxu0 %v1165_v26  ;;  %v191_v26 = vld [vmem:[#allocation8] sm:$0x3]  ;;  %v1096_v19 = vld [vmem:[#allocation9 + $0xa0] sm:$0xf]  ;;  %v1421_v20 = vld [vmem:[#allocation9 + $0xb4] sm:$0xf0] }
  0x4f   :  { %883 = vmatpush.bf16.msra.mxu1 %v1357_v27  ;;  %847 = vmatpush.bf16.msrb.mxu2 %v1089_v43  ;;  %v193_v27 = vperm.slane %v191_v26, 0  ;;  %v194_v28 = vperm.slane %v191_v26, 1  ;;  %v1385_v43 = vor.u32 %v1493_v33, %v1384_v32  ;;  %v1288_v23 = vld [vmem:[#allocation9 + $0x220] sm:$0xf]  ;;  %v1469_v24 = vld [vmem:[#allocation9 + $0x234] sm:$0xf0]  ;;  %v1097_v29 = vor.u32 %v1421_v20, %v1096_v19 }
  0x50   :  { %860 = vmatpush.bf16.msrb.mxu3 %v1281_v45  ;;  %v1439_v45 = vld [vmem:[#allocation9 + $0x144] sm:$0xf0]  ;;  %v1098_v26 = vld [vmem:[#allocation9 + $0xb8] sm:$0xf0]  ;;  %v1289_v30 = vor.u32 %v1469_v24, %v1288_v23  ;;  %v1412_v37 = vld [vmem:[#allocation9 + $0x74] sm:$0xf] }
  0x51   :  { %v1169_v55 = vor.u32 %v1439_v45, %v1168_v44  ;;  %v1415_v32 = vld [vmem:[#allocation9 + $0x84] sm:$0xf0]  ;;  %v1048_v44 = vld [vmem:[#allocation9 + $0x40] sm:$0xf]  ;;  %v1409_v45 = vld [vmem:[#allocation9 + $0x54] sm:$0xf0] }
  0x52   :  { %871 = vmatpush.bf16.msra.mxu0 %v1141_v38  ;;  %v1490_v38 = vld [vmem:[#allocation9 + $0x2e4] sm:$0xf]  ;;  %v1451_v62 = vld [vmem:[#allocation9 + $0x1a4] sm:$0xf0]  ;;  %v1400_v63 = vld [vmem:[#allocation9 + $0x14] sm:$0xf] }
  0x53   :  { %884 = vmatpush.bf16.msra.mxu1 %v1333_v39  ;;  %848 = vmatpush.bf16.msrb.mxu2 %v1065_v54  ;;  %v1386_v39 = vld [vmem:[#allocation9 + $0x2f8] sm:$0xf0]  ;;  %v1362_v54 = vld [vmem:[#allocation9 + $0x2c8] sm:$0xf0]  ;;  %s1665_s2 = smov [#allocation12]   ;;  %s960_s21 = sshll.u32 %s1737_s5, 4  ;;  %s961_s21 = int_to_ptr.hbm [resolvable:$true] %s960_s21 }
  0x54   :  { %861 = vmatpush.bf16.msrb.mxu3 %v1257_v57  ;;  %v1389_v48 = vor.u32 %v1490_v38, %v1386_v39  ;;  %v1144_v57 = vld [vmem:[#allocation9 + $0x100] sm:$0xf]  ;;  %v1365_v61 = vor.u32 %v1484_v53, %v1362_v54  ;;  %v1074_v38 = vld [vmem:[#allocation9 + $0x88] sm:$0xf0]  ;;  %v1460_v39 = vld [vmem:[#allocation9 + $0x1f4] sm:$0xf] }
  0x55   :  { %v1454_v53 = vld [vmem:[#allocation9 + $0x1c4] sm:$0xf]  ;;  %v1242_v54 = vld [vmem:[#allocation9 + $0x1d8] sm:$0xf0]  ;;  %s958_s4 = sshll.u32 %s1665_s2, 4  ;;  %s959_s4 = int_to_ptr.vmem [resolvable:$true] %s958_s4 }
  0x56   :  { %872 = vmatpush.bf16.msra.mxu0 %v1117_v50  ;;  %v1487_v50 = vld [vmem:[#allocation9 + $0x2c4] sm:$0xf0] }
  0x57   :  { %885 = vmatpush.bf16.msra.mxu1 %v1309_v51  ;;  %849 = vmatpush.bf16.msrb.mxu2 %v1041_v4  ;;  %v1436_v51 = vld [vmem:[#allocation9 + $0x134] sm:$0xf]  ;;  %v1361_v56 = vor.u32 %v1487_v50, %v1360_v49  ;;  %v1338_v4 = vld [vmem:[#allocation9 + $0x298] sm:$0xf0]  ;;  %v1240_v49 = vld [vmem:[#allocation9 + $0x1c0] sm:$0xf] }
  0x58   :  { %862 = vmatpush.bf16.msrb.mxu3 %v1233_v7  ;;  %v1173_v60 = vor.u32 %v1436_v51, %v1170_v52  ;;  %v1120_v7 = vld [vmem:[#allocation9 + $0xd0] sm:$0xf]  ;;  %v1341_v10 = vor.u32 %v1478_v3, %v1338_v4  ;;  %v1457_v50 = vld [vmem:[#allocation9 + $0x1d4] sm:$0xf0]  ;;  %v1406_v51 = vld [vmem:[#allocation9 + $0x44] sm:$0xf] }
  0x59   :  { %v1050_v52 = vld [vmem:[#allocation9 + $0x58] sm:$0xf0] }
  0x5a   :  { %873 = vmatpush.bf16.msra.mxu0 %v1093_v58  ;;  %v1433_v58 = vld [vmem:[#allocation9 + $0x114] sm:$0xf0] }
  0x5b   :  { %886 = vmatpush.bf16.msra.mxu1 %v1285_v59  ;;  %850 = vmatpush.bf16.msrb.mxu2 %v1017_v17  ;;  %v1145_v5 = vor.u32 %v1433_v58, %v1144_v57  ;;  %v1121_v17 = vor.u32 %v1427_v8, %v1120_v7  ;;  %v1024_v57 = vld [vmem:[#allocation9 + $0x10] sm:$0xf]  ;;  %v1403_v58 = vld [vmem:[#allocation9 + $0x24] sm:$0xf0]  ;;  %v297_v7 = vld [vmem:[#allocation11] sm:$0x3f] }
  0x5c   :  { %863 = vmatpush.bf16.msrb.mxu3 %v1209_v21  ;;  %v1025_v3 = vor.u32 %v1403_v58, %v1024_v57  ;;  %v300_v8 = vperm.slane %v297_v7, 1  ;;  %v302_v20 = vperm.slane %v297_v7, 3 }
  0x5e   :  { %874 = vmatpush.bf16.msra.mxu0 %v1069_v0  ;;  %v1430_v0 = vld [vmem:[#allocation9 + $0x104] sm:$0xf] }
  0x5f   :  { %887 = vmatpush.bf16.msra.mxu1 %v1261_v1  ;;  %v1149_v9 = vor.u32 %v1430_v0, %v1146_v2  ;;  %v1026_v0 = vld [vmem:[#allocation9 + $0x28] sm:$0xf0] }
  0x60   :  { %v1218_v2 = vld [vmem:[#allocation9 + $0x1a8] sm:$0xf0] }
  0x62   :  { %875 = vmatpush.bf16.msra.mxu0 %v1045_v11  ;;  %v1312_v11 = vld [vmem:[#allocation9 + $0x250] sm:$0xf] }
  0x63   :  { %888 = vmatpush.bf16.msra.mxu1 %v1237_v13  ;;  %v1424_v13 = vld [vmem:[#allocation9 + $0xd4] sm:$0xf]  ;;  %v1313_v18 = vor.u32 %v1475_v12, %v1312_v11 }
  0x64   :  { %v1125_v21 = vor.u32 %v1424_v13, %v1122_v14  ;;  %v299_v13 = vperm.slane %v297_v7, 0 }
  0x66   :  { %876 = vmatpush.bf16.msra.mxu0 %v1021_v22  ;;  %v1317_v22 = vor.u32 %v1472_v15, %v1314_v16 }
  0x67   :  { %889 = vmatpush.bf16.msra.mxu1 %v1213_v25  ;;  %v1418_v25 = vld [vmem:[#allocation9 + $0xa4] sm:$0xf] }
  0x68   :  { %v1101_v33 = vor.u32 %v1418_v25, %v1098_v26  ;;  %v301_v25 = vperm.slane %v297_v7, 2 }
  0xa6   :  { %v165_v31 = vpop.f32.mrf.mxu0 }
  0xa7   :  { %v197_v35 = vadd.f32 %v193_v27, %v165_v31  ;;  %v178_v36 = vpop.f32.mrf.mxu1  ;;  %v1466_v27 = vld [vmem:[#allocation9 + $0x224] sm:$0xf]  ;;  %v1072_v31 = vld [vmem:[#allocation9 + $0x70] sm:$0xf] }
  0xa8   :  { %v198_v40 = vadd.f32 %v194_v28, %v178_v36  ;;  %v1290_v28 = vld [vmem:[#allocation9 + $0x238] sm:$0xf0]  ;;  %v1463_v36 = vld [vmem:[#allocation9 + $0x204] sm:$0xf0] }
  0xa9   :  { %v1713_v41 = vpack.c.bf16 %v197_v35, %v197_v35  ;;  %v1293_v34 = vor.u32 %v1466_v27, %v1290_v28  ;;  %v1264_v35 = vld [vmem:[#allocation9 + $0x1f0] sm:$0xf] }
  0xaa   :  { %v1715_v46 = vpack.c.bf16 %v198_v40, %v198_v40  ;;  %v1266_v40 = vld [vmem:[#allocation9 + $0x208] sm:$0xf0] }
  0xab   :  { %799 = vmatmul.bf16.vlgmr.msra.gmra.mxu2 %v1713_v41  ;;  %825 = vmatmul.bf16.vlgmr.msrb.gmra.mxu0 %v1713_v41 }
  0xac   :  { %812 = vmatmul.bf16.vlgmr.msra.gmra.mxu3 %v1715_v46  ;;  %838 = vmatmul.bf16.vlgmr.msrb.gmra.mxu1 %v1715_v46 }
  0xad   :  { %895 = vmatpush.bf16.msra.mxu2 %v1193_v42  ;;  %908 = vmatpush.bf16.msra.mxu3 %v1385_v43  ;;  %v1073_v42 = vor.u32 %v1415_v32, %v1072_v31  ;;  %v1265_v43 = vor.u32 %v1463_v36, %v1264_v35 }
  0xae   :  { %921 = vmatpush.bf16.msrb.mxu0 %v1197_v47  ;;  %934 = vmatpush.bf16.msrb.mxu1 %v1389_v48  ;;  %v167_v59 = vpop.f32.mrf.mxu0  ;;  %v1077_v47 = vor.u32 %v1412_v37, %v1074_v38  ;;  %v1269_v48 = vor.u32 %v1460_v39, %v1266_v40  ;;  %v303_v38 = vperm.slane %v297_v7, 4 }
  0xaf   :  { %v180_v1 = vpop.f32.mrf.mxu1  ;;  %v1053_v59 = vor.u32 %v1406_v51, %v1050_v52 }
  0xb0   :  { %v1448_v1 = vld [vmem:[#allocation9 + $0x194] sm:$0xf] }
  0xb1   :  { %896 = vmatpush.bf16.msra.mxu2 %v1169_v55  ;;  %909 = vmatpush.bf16.msra.mxu3 %v1361_v56  ;;  %v1049_v55 = vor.u32 %v1409_v45, %v1048_v44  ;;  %v1241_v56 = vor.u32 %v1457_v50, %v1240_v49 }
  0xb2   :  { %922 = vmatpush.bf16.msrb.mxu0 %v1173_v60  ;;  %935 = vmatpush.bf16.msrb.mxu1 %v1365_v61  ;;  %v1245_v60 = vor.u32 %v1454_v53, %v1242_v54  ;;  %v1216_v61 = vld [vmem:[#allocation9 + $0x190] sm:$0xf] }
  0xb3   :  { %v1217_v4 = vor.u32 %v1451_v62, %v1216_v61 }
  0xb5   :  { %897 = vmatpush.bf16.msra.mxu2 %v1145_v5  ;;  %910 = vmatpush.bf16.msra.mxu3 %v1337_v6  ;;  %v1029_v5 = vor.u32 %v1400_v63, %v1026_v0  ;;  %v1221_v6 = vor.u32 %v1448_v1, %v1218_v2 }
  0xb6   :  { %923 = vmatpush.bf16.msrb.mxu0 %v1149_v9  ;;  %936 = vmatpush.bf16.msrb.mxu1 %v1341_v10 }
  0xb9   :  { %898 = vmatpush.bf16.msra.mxu2 %v1121_v17  ;;  %911 = vmatpush.bf16.msra.mxu3 %v1313_v18 }
  0xba   :  { %924 = vmatpush.bf16.msrb.mxu0 %v1125_v21  ;;  %937 = vmatpush.bf16.msrb.mxu1 %v1317_v22 }
  0xbb   :  { %851 = vmatmul.bf16.vlgmr.msrb.gmra.mxu2 %v1713_v41  ;;  %877 = vmatmul.bf16.vlgmr.msra.gmra.mxu0 %v1713_v41 }
  0xbc   :  { %864 = vmatmul.bf16.vlgmr.msrb.gmra.mxu3 %v1715_v46  ;;  %890 = vmatmul.bf16.vlgmr.msra.gmra.mxu1 %v1715_v46 }
  0xbd   :  { %899 = vmatpush.bf16.msra.mxu2 %v1097_v29  ;;  %912 = vmatpush.bf16.msra.mxu3 %v1289_v30 }
  0xbe   :  { %925 = vmatpush.bf16.msrb.mxu0 %v1101_v33  ;;  %938 = vmatpush.bf16.msrb.mxu1 %v1293_v34  ;;  %v304_v34 = vperm.slane %v297_v7, 5 }
  0xc1   :  { %900 = vmatpush.bf16.msra.mxu2 %v1073_v42  ;;  %913 = vmatpush.bf16.msra.mxu3 %v1265_v43 }
  0xc2   :  { %926 = vmatpush.bf16.msrb.mxu0 %v1077_v47  ;;  %939 = vmatpush.bf16.msrb.mxu1 %v1269_v48 }
  0xc5   :  { %901 = vmatpush.bf16.msra.mxu2 %v1049_v55  ;;  %914 = vmatpush.bf16.msra.mxu3 %v1241_v56 }
  0xc6   :  { %927 = vmatpush.bf16.msrb.mxu0 %v1053_v59  ;;  %940 = vmatpush.bf16.msrb.mxu1 %v1245_v60 }
  0xc9   :  { %902 = vmatpush.bf16.msra.mxu2 %v1025_v3  ;;  %915 = vmatpush.bf16.msra.mxu3 %v1217_v4 }
  0xca   :  { %928 = vmatpush.bf16.msrb.mxu0 %v1029_v5  ;;  %941 = vmatpush.bf16.msrb.mxu1 %v1221_v6 }
  0xcc   :  { %903 = vmatmul.bf16.vlgmr.msra.gmra.mxu2 %v1713_v41  ;;  %916 = vmatmul.bf16.vlgmr.msra.gmra.mxu3 %v1715_v46 }
  0xcd   :  { %929 = vmatmul.bf16.vlgmr.msrb.gmra.mxu0 %v1713_v41  ;;  %942 = vmatmul.bf16.vlgmr.msrb.gmra.mxu1 %v1715_v46 }
 0x128   :  { %v826_v9 = vpop.f32.mrf.mxu0 }
 0x129   :  { %v827_v10 = vadd.f32 %v826_v9, %v300_v8  ;;  %v839_v11 = vpop.f32.mrf.mxu1 }
 0x12b   :  { %v840_v12 = vadd.f32 %v839_v11, %v827_v10 }
 0x12d   :  { %948 = vst [vmem:[#allocation12 + $0x8] sm:$0xff] %v840_v12 }
 0x12e   :  { %v800_v14 = vpop.f32.mrf.mxu2 }
 0x12f   :  { %v801_v15 = vadd.f32 %v800_v14, %v299_v13  ;;  %v813_v16 = vpop.f32.mrf.mxu3 }
 0x130   :  { %v828_v17 = vpop.f32.mrf.mxu0 }
 0x131   :  { %v814_v18 = vadd.f32 %v813_v16, %v801_v15  ;;  %v841_v19 = vpop.f32.mrf.mxu1 }
 0x133   :  { %947 = vst [vmem:[#allocation12] sm:$0xff] %v814_v18 }
 0x136   :  { %v802_v21 = vpop.f32.mrf.mxu2 }
 0x137   :  { %v815_v41 = vpop.f32.mrf.mxu3 }
 0x138   :  { %v878_v22 = vpop.f32.mrf.mxu0 }
 0x139   :  { %v879_v46 = vadd.f32 %v878_v22, %v302_v20  ;;  %v891_v23 = vpop.f32.mrf.mxu1 }
 0x13b   :  { %v892_v24 = vadd.f32 %v891_v23, %v879_v46 }
 0x13d   :  { %950 = vst [vmem:[#allocation12 + $0x18] sm:$0xff] %v892_v24 }
 0x13e   :  { %v852_v26 = vpop.f32.mrf.mxu2 }
 0x13f   :  { %v853_v27 = vadd.f32 %v852_v26, %v301_v25  ;;  %v865_v28 = vpop.f32.mrf.mxu3 }
 0x140   :  { %v880_v29 = vpop.f32.mrf.mxu0 }
 0x141   :  { %v866_v30 = vadd.f32 %v865_v28, %v853_v27  ;;  %v893_v31 = vpop.f32.mrf.mxu1 }
 0x143   :  { %949 = vst [vmem:[#allocation12 + $0x10] sm:$0xff] %v866_v30 }
 0x146   :  { %v854_v32 = vpop.f32.mrf.mxu2 }
 0x147   :  { %v867_v33 = vpop.f32.mrf.mxu3 }
 0x14a   :  { %v930_v35 = vpop.f32.mrf.mxu0  ;;  %v943_v36 = vpop.f32.mrf.mxu1 }
 0x14b   :  { %v931_v37 = vadd.f32 %v930_v35, %v304_v34 }
 0x14d   :  { %v944_v39 = vadd.f32 %v943_v36, %v931_v37 }
 0x14f   :  { %952 = vst [vmem:[#allocation12 + $0x28] sm:$0xff] %v944_v39  ;;  %v904_v40 = vpop.f32.mrf.mxu2  ;;  %v917_v42 = vpop.f32.mrf.mxu3 }
 0x150   :  { %v905_v43 = vadd.f32 %v904_v40, %v303_v38 }
 0x152   :  { %v918_v44 = vadd.f32 %v917_v42, %v905_v43  ;;  %v932_v45 = vpop.f32.mrf.mxu0  ;;  %v945_v47 = vpop.f32.mrf.mxu1 }
 0x154   :  { %951 = vst [vmem:[#allocation12 + $0x20] sm:$0xff] %v918_v44 }
 0x155   :  { %963 = dma.vmem_to_hbm [thread:$0]  %s959_s4, 768, %s961_s21, [#allocation5]  }
 0x157   :  { %v906_v48 = vpop.f32.mrf.mxu2  ;;  %v919_v49 = vpop.f32.mrf.mxu3 }
 0x158   :  { %1654 = dma.done.wait [#allocation5], 768  }
 0x159   :  { %1655 = vsyncadd [#allocation5], 4294966528 }
 0x15a   :  { %968 = vsyncpa [#allocation4], 1 }
 0x15b   :  { %969 = vsyncpa [#allocation7], 1 }
 0x15c   :  { %970 = vsyncpa [#allocation10], 1 }
 0x15d   :  { %971 = vsyncpa [#allocation5], 1 }

</bundles_post_ra>
